<compile_context>
chip_gen: v5e
topology: v5e:2x2
jax: 0.10.0
libtpu: 0.0.40
codegen_flags: <defaults>
</compile_context>

<pallas_src>
import jax
import jax.numpy as jnp
from jax.experimental import pallas as pl
from jax.experimental.pallas import tpu as pltpu


def _round_up(x, m):
    return (x + m - 1) // m * m


def _make_lstm_kernel(S, B, I, H, row_b, row_whh, row_wlin, row_blin):
    """Build the kernel with static sizes / slab row offsets baked in."""

    def kernel(x_ref, slab_ref, out_ref):
        slab = slab_ref[...]                              # (rows, 4H), one load
        wih = slab[0:I, :]                                # (I, 4H)  i/f/o cols pre-scaled 0.5
        bias = slab[row_b:row_b + 1, :]                   # (1, 4H)  i/f/o entries pre-scaled 0.5
        whh = slab[row_whh:row_whh + H, :]                # (H, 4H)  i/f/o cols pre-scaled 0.5
        wlin = slab[row_wlin:row_wlin + 1, 0:H]           # (1, H)
        blin = slab[row_blin:row_blin + 1, 0:1]           # (1, 1)

        # ---- Hoisted input projection for all timesteps (no serial dependency) ----
        xproj = jnp.dot(x_ref[...], wih,
                        preferred_element_type=jnp.float32) + bias    # (S*B, 4H)

        h = jnp.zeros((B, H), jnp.float32)
        c = jnp.zeros((B, H), jnp.float32)

        # ---- Recurrence: fully unrolled at trace time (S is a small static int), static slice
        # offsets, h/c carried as register values.
        for t in range(S):
            gates = xproj[t * B:(t + 1) * B, :] + jnp.dot(
                h, whh, preferred_element_type=jnp.float32)           # (B, 4H)

            # Single full-vreg tanh; i/f/o pre-scaled by 0.5 so sigmoid(z) = 0.5*tanh(z/2) + 0.5.
            tg = jnp.tanh(gates)
            i_g = 0.5 * tg[:, 0 * H:1 * H] + 0.5
            f_g = 0.5 * tg[:, 1 * H:2 * H] + 0.5
            g_g = tg[:, 2 * H:3 * H]
            o_g = 0.5 * tg[:, 3 * H:4 * H] + 0.5

            c = f_g * c + i_g * g_g
            h = o_g * jnp.tanh(c)

        # ---- Linear(H -> 1) on the last timestep's hidden state, as a lane reduction
        # (no relayout; both (1,B)/(B,1) outputs are sub-128 masked stores anyway).
        out_ref[...] = jnp.sum(h * wlin, axis=-1, keepdims=True) + blin   # (B, 1)

    return kernel


def lstm_forward(x, w_ih, w_hh, b_ih, b_hh, w_lin, b_lin):
    """x: (S, B, I) float32. Returns (B,) float32 (matches self.lin(x[-1]).squeeze(1))."""
    S, B, I = x.shape
    H = w_hh.shape[1]
    G = 4 * H

    # sigmoid-via-tanh pre-scale: 0.5 on i/f/o gate columns, 1.0 on the g gate.
    scale = jnp.concatenate([
        jnp.full((H,), 0.5, jnp.float32),   # i
        jnp.full((H,), 0.5, jnp.float32),   # f
        jnp.ones((H,), jnp.float32),        # g
        jnp.full((H,), 0.5, jnp.float32),   # o
    ])

    w_ih_t = jnp.transpose(w_ih).astype(jnp.float32) * scale          # (I, 4H)
    w_hh_t = jnp.transpose(w_hh).astype(jnp.float32) * scale          # (H, 4H)
    bias = (b_ih + b_hh).astype(jnp.float32) * scale                  # (4H,)

    # Pack loop-invariant operands into one sublane-aligned slab -> single DMA.
    row_b = _round_up(I, 8)
    row_whh = row_b + 8
    row_wlin = row_whh + _round_up(H, 8)
    row_blin = row_wlin + 8
    rows = row_blin + 8

    slab = jnp.zeros((rows, G), jnp.float32)
    slab = slab.at[0:I, :].set(w_ih_t)
    slab = slab.at[row_b, :].set(bias)
    slab = slab.at[row_whh:row_whh + H, :].set(w_hh_t)
    slab = slab.at[row_wlin, 0:H].set(w_lin.reshape(H).astype(jnp.float32))
    slab = slab.at[row_blin, :].set(b_lin.reshape(())[()].astype(jnp.float32))

    # Row t*B + b  ==  (timestep t, batch b)
    x_flat = x.reshape(S * B, I).astype(jnp.float32)

    vmem_spec = pl.BlockSpec(memory_space=pltpu.MemorySpace.VMEM)

    out = pl.pallas_call(
        _make_lstm_kernel(S, B, I, H, row_b, row_whh, row_wlin, row_blin),
        out_shape=jax.ShapeDtypeStruct((B, 1), jnp.float32),
        in_specs=[vmem_spec, vmem_spec],     # whole arrays, single DMA each, no pipelining
        out_specs=vmem_spec,
    )(x_flat, slab)

    return out.reshape(B)


def lstm_reference(x, w_ih, w_hh, b_ih, b_hh, w_lin, b_lin):
    """Pure-JAX reference matching PyTorch nn.LSTM + Linear semantics."""
    S, B, I = x.shape
    H = w_hh.shape[1]
    h = jnp.zeros((B, H), jnp.float32)
    c = jnp.zeros((B, H), jnp.float32)

    def step(carry, x_t):
        h, c = carry
        gates = x_t @ w_ih.T + h @ w_hh.T + b_ih + b_hh
        i_g = jax.nn.sigmoid(gates[:, 0 * H:1 * H])
        f_g = jax.nn.sigmoid(gates[:, 1 * H:2 * H])
        g_g = jnp.tanh(gates[:, 2 * H:3 * H])
        o_g = jax.nn.sigmoid(gates[:, 3 * H:4 * H])
        c_new = f_g * c + i_g * g_g
        h_new = o_g * jnp.tanh(c_new)
        return (h_new, c_new), None

    (h, c), _ = jax.lax.scan(step, (h, c), x)
    return (h @ w_lin.T + b_lin).reshape(B)


if __name__ == "__main__":
    # args.hidden_size -> pick 32; input size fixed at 2 by the module.
    SEQ, BATCH, INPUT, HIDDEN = 8, 2, 2, 32

    key = jax.random.PRNGKey(0)
    ks = jax.random.split(key, 8)
    bound = 1.0 / (HIDDEN ** 0.5)

    x = jax.random.normal(ks[0], (SEQ, BATCH, INPUT), jnp.float32)
    w_ih = jax.random.uniform(ks[1], (4 * HIDDEN, INPUT), jnp.float32, -bound, bound)
    w_hh = jax.random.uniform(ks[2], (4 * HIDDEN, HIDDEN), jnp.float32, -bound, bound)
    b_ih = jax.random.uniform(ks[3], (4 * HIDDEN,), jnp.float32, -bound, bound)
    b_hh = jax.random.uniform(ks[4], (4 * HIDDEN,), jnp.float32, -bound, bound)
    w_lin = jax.random.uniform(ks[5], (1, HIDDEN), jnp.float32, -bound, bound)
    b_lin = jax.random.uniform(ks[6], (1,), jnp.float32, -bound, bound)

    out = lstm_forward(x, w_ih, w_hh, b_ih, b_hh, w_lin, b_lin)
    jax.block_until_ready(out)

    ref = lstm_reference(x, w_ih, w_hh, b_ih, b_hh, w_lin, b_lin)
    assert out.shape == (BATCH,), out.shape
    assert jnp.allclose(out, ref, atol=1e-5, rtol=1e-5), (out, ref)

    print("KERNEL_OK")
</pallas_src>

<mosaic_0001>
module attributes {stable_mosaic.version = 11 : i64} {
  func.func @kernel(%arg0: memref<16x2xf32, #tpu.memory_space<vmem>>, %arg1: memref<64x128xf32, #tpu.memory_space<vmem>>, %arg2: memref<2x1xf32, #tpu.memory_space<vmem>>) attributes {dimension_semantics = [], scalar_prefetch = 0 : i64, scratch_operands = 0 : i64, tpu.core_type = #tpu.core_type<tc>} {
    %c0 = arith.constant 0 : index
    %c0_0 = arith.constant 0 : index
    %0 = vector.load %arg1[%c0, %c0_0] : memref<64x128xf32, #tpu.memory_space<vmem>>, vector<64x128xf32>
    %1 = vector.extract_strided_slice %0 {offsets = [0, 0], sizes = [2, 128], strides = [1, 1]} : vector<64x128xf32> to vector<2x128xf32>
    %2 = vector.extract_strided_slice %0 {offsets = [8, 0], sizes = [1, 128], strides = [1, 1]} : vector<64x128xf32> to vector<1x128xf32>
    %3 = vector.extract_strided_slice %0 {offsets = [16, 0], sizes = [32, 128], strides = [1, 1]} : vector<64x128xf32> to vector<32x128xf32>
    %4 = vector.extract_strided_slice %0 {offsets = [48, 0], sizes = [1, 32], strides = [1, 1]} : vector<64x128xf32> to vector<1x32xf32>
    %5 = vector.extract_strided_slice %0 {offsets = [56, 0], sizes = [1, 1], strides = [1, 1]} : vector<64x128xf32> to vector<1x1xf32>
    %c0_1 = arith.constant 0 : index
    %c0_2 = arith.constant 0 : index
    %6 = vector.load %arg0[%c0_1, %c0_2] : memref<16x2xf32, #tpu.memory_space<vmem>>, vector<16x2xf32>
    %cst = arith.constant dense<0.000000e+00> : vector<16x128xf32>
    %7 = tpu.matmul %6, %1, %cst {dimension_numbers = #tpu.dot_dimension_numbers<[1], [0], [0], [1], [0, 0, 1, 1], [], []>} : vector<16x2xf32>, vector<2x128xf32>, vector<16x128xf32> -> vector<16x128xf32>
    %8 = vector.broadcast %2 : vector<1x128xf32> to vector<16x128xf32>
    %9 = arith.addf %7, %8 : vector<16x128xf32>
    %cst_3 = arith.constant 0.000000e+00 : f32
    %10 = vector.broadcast %cst_3 : f32 to vector<2x32xf32>
    %cst_4 = arith.constant 0.000000e+00 : f32
    %11 = vector.broadcast %cst_4 : f32 to vector<2x32xf32>
    %12 = vector.extract_strided_slice %9 {offsets = [0, 0], sizes = [2, 128], strides = [1, 1]} : vector<16x128xf32> to vector<2x128xf32>
    %cst_5 = arith.constant dense<0.000000e+00> : vector<2x128xf32>
    %13 = tpu.matmul %10, %3, %cst_5 {dimension_numbers = #tpu.dot_dimension_numbers<[1], [0], [0], [1], [0, 0, 1, 1], [], []>} : vector<2x32xf32>, vector<32x128xf32>, vector<2x128xf32> -> vector<2x128xf32>
    %14 = arith.addf %12, %13 : vector<2x128xf32>
    %15 = math.tanh %14 : vector<2x128xf32>
    %16 = vector.extract_strided_slice %15 {offsets = [0, 0], sizes = [2, 32], strides = [1, 1]} : vector<2x128xf32> to vector<2x32xf32>
    %cst_6 = arith.constant 5.000000e-01 : f32
    %17 = vector.broadcast %cst_6 : f32 to vector<2x32xf32>
    %18 = arith.mulf %17, %16 : vector<2x32xf32>
    %cst_7 = arith.constant 5.000000e-01 : f32
    %19 = vector.broadcast %cst_7 : f32 to vector<2x32xf32>
    %20 = arith.addf %18, %19 : vector<2x32xf32>
    %21 = vector.extract_strided_slice %15 {offsets = [0, 32], sizes = [2, 32], strides = [1, 1]} : vector<2x128xf32> to vector<2x32xf32>
    %cst_8 = arith.constant 5.000000e-01 : f32
    %22 = vector.broadcast %cst_8 : f32 to vector<2x32xf32>
    %23 = arith.mulf %22, %21 : vector<2x32xf32>
    %cst_9 = arith.constant 5.000000e-01 : f32
    %24 = vector.broadcast %cst_9 : f32 to vector<2x32xf32>
    %25 = arith.addf %23, %24 : vector<2x32xf32>
    %26 = vector.extract_strided_slice %15 {offsets = [0, 64], sizes = [2, 32], strides = [1, 1]} : vector<2x128xf32> to vector<2x32xf32>
    %27 = vector.extract_strided_slice %15 {offsets = [0, 96], sizes = [2, 32], strides = [1, 1]} : vector<2x128xf32> to vector<2x32xf32>
    %cst_10 = arith.constant 5.000000e-01 : f32
    %28 = vector.broadcast %cst_10 : f32 to vector<2x32xf32>
    %29 = arith.mulf %28, %27 : vector<2x32xf32>
    %cst_11 = arith.constant 5.000000e-01 : f32
    %30 = vector.broadcast %cst_11 : f32 to vector<2x32xf32>
    %31 = arith.addf %29, %30 : vector<2x32xf32>
    %32 = arith.mulf %25, %11 : vector<2x32xf32>
    %33 = arith.mulf %20, %26 : vector<2x32xf32>
    %34 = arith.addf %32, %33 : vector<2x32xf32>
    %35 = math.tanh %34 : vector<2x32xf32>
    %36 = arith.mulf %31, %35 : vector<2x32xf32>
    %37 = vector.extract_strided_slice %9 {offsets = [2, 0], sizes = [2, 128], strides = [1, 1]} : vector<16x128xf32> to vector<2x128xf32>
    %cst_12 = arith.constant dense<0.000000e+00> : vector<2x128xf32>
    %38 = tpu.matmul %36, %3, %cst_12 {dimension_numbers = #tpu.dot_dimension_numbers<[1], [0], [0], [1], [0, 0, 1, 1], [], []>} : vector<2x32xf32>, vector<32x128xf32>, vector<2x128xf32> -> vector<2x128xf32>
    %39 = arith.addf %37, %38 : vector<2x128xf32>
    %40 = math.tanh %39 : vector<2x128xf32>
    %41 = vector.extract_strided_slice %40 {offsets = [0, 0], sizes = [2, 32], strides = [1, 1]} : vector<2x128xf32> to vector<2x32xf32>
    %cst_13 = arith.constant 5.000000e-01 : f32
    %42 = vector.broadcast %cst_13 : f32 to vector<2x32xf32>
    %43 = arith.mulf %42, %41 : vector<2x32xf32>
    %cst_14 = arith.constant 5.000000e-01 : f32
    %44 = vector.broadcast %cst_14 : f32 to vector<2x32xf32>
    %45 = arith.addf %43, %44 : vector<2x32xf32>
    %46 = vector.extract_strided_slice %40 {offsets = [0, 32], sizes = [2, 32], strides = [1, 1]} : vector<2x128xf32> to vector<2x32xf32>
    %cst_15 = arith.constant 5.000000e-01 : f32
    %47 = vector.broadcast %cst_15 : f32 to vector<2x32xf32>
    %48 = arith.mulf %47, %46 : vector<2x32xf32>
    %cst_16 = arith.constant 5.000000e-01 : f32
    %49 = vector.broadcast %cst_16 : f32 to vector<2x32xf32>
    %50 = arith.addf %48, %49 : vector<2x32xf32>
    %51 = vector.extract_strided_slice %40 {offsets = [0, 64], sizes = [2, 32], strides = [1, 1]} : vector<2x128xf32> to vector<2x32xf32>
    %52 = vector.extract_strided_slice %40 {offsets = [0, 96], sizes = [2, 32], strides = [1, 1]} : vector<2x128xf32> to vector<2x32xf32>
    %cst_17 = arith.constant 5.000000e-01 : f32
    %53 = vector.broadcast %cst_17 : f32 to vector<2x32xf32>
    %54 = arith.mulf %53, %52 : vector<2x32xf32>
    %cst_18 = arith.constant 5.000000e-01 : f32
    %55 = vector.broadcast %cst_18 : f32 to vector<2x32xf32>
    %56 = arith.addf %54, %55 : vector<2x32xf32>
    %57 = arith.mulf %50, %34 : vector<2x32xf32>
    %58 = arith.mulf %45, %51 : vector<2x32xf32>
    %59 = arith.addf %57, %58 : vector<2x32xf32>
    %60 = math.tanh %59 : vector<2x32xf32>
    %61 = arith.mulf %56, %60 : vector<2x32xf32>
    %62 = vector.extract_strided_slice %9 {offsets = [4, 0], sizes = [2, 128], strides = [1, 1]} : vector<16x128xf32> to vector<2x128xf32>
    %cst_19 = arith.constant dense<0.000000e+00> : vector<2x128xf32>
    %63 = tpu.matmul %61, %3, %cst_19 {dimension_numbers = #tpu.dot_dimension_numbers<[1], [0], [0], [1], [0, 0, 1, 1], [], []>} : vector<2x32xf32>, vector<32x128xf32>, vector<2x128xf32> -> vector<2x128xf32>
    %64 = arith.addf %62, %63 : vector<2x128xf32>
    %65 = math.tanh %64 : vector<2x128xf32>
    %66 = vector.extract_strided_slice %65 {offsets = [0, 0], sizes = [2, 32], strides = [1, 1]} : vector<2x128xf32> to vector<2x32xf32>
    %cst_20 = arith.constant 5.000000e-01 : f32
    %67 = vector.broadcast %cst_20 : f32 to vector<2x32xf32>
    %68 = arith.mulf %67, %66 : vector<2x32xf32>
    %cst_21 = arith.constant 5.000000e-01 : f32
    %69 = vector.broadcast %cst_21 : f32 to vector<2x32xf32>
    %70 = arith.addf %68, %69 : vector<2x32xf32>
    %71 = vector.extract_strided_slice %65 {offsets = [0, 32], sizes = [2, 32], strides = [1, 1]} : vector<2x128xf32> to vector<2x32xf32>
    %cst_22 = arith.constant 5.000000e-01 : f32
    %72 = vector.broadcast %cst_22 : f32 to vector<2x32xf32>
    %73 = arith.mulf %72, %71 : vector<2x32xf32>
    %cst_23 = arith.constant 5.000000e-01 : f32
    %74 = vector.broadcast %cst_23 : f32 to vector<2x32xf32>
    %75 = arith.addf %73, %74 : vector<2x32xf32>
    %76 = vector.extract_strided_slice %65 {offsets = [0, 64], sizes = [2, 32], strides = [1, 1]} : vector<2x128xf32> to vector<2x32xf32>
    %77 = vector.extract_strided_slice %65 {offsets = [0, 96], sizes = [2, 32], strides = [1, 1]} : vector<2x128xf32> to vector<2x32xf32>
    %cst_24 = arith.constant 5.000000e-01 : f32
    %78 = vector.broadcast %cst_24 : f32 to vector<2x32xf32>
    %79 = arith.mulf %78, %77 : vector<2x32xf32>
    %cst_25 = arith.constant 5.000000e-01 : f32
    %80 = vector.broadcast %cst_25 : f32 to vector<2x32xf32>
    %81 = arith.addf %79, %80 : vector<2x32xf32>
    %82 = arith.mulf %75, %59 : vector<2x32xf32>
    %83 = arith.mulf %70, %76 : vector<2x32xf32>
    %84 = arith.addf %82, %83 : vector<2x32xf32>
    %85 = math.tanh %84 : vector<2x32xf32>
    %86 = arith.mulf %81, %85 : vector<2x32xf32>
    %87 = vector.extract_strided_slice %9 {offsets = [6, 0], sizes = [2, 128], strides = [1, 1]} : vector<16x128xf32> to vector<2x128xf32>
    %cst_26 = arith.constant dense<0.000000e+00> : vector<2x128xf32>
    %88 = tpu.matmul %86, %3, %cst_26 {dimension_numbers = #tpu.dot_dimension_numbers<[1], [0], [0], [1], [0, 0, 1, 1], [], []>} : vector<2x32xf32>, vector<32x128xf32>, vector<2x128xf32> -> vector<2x128xf32>
    %89 = arith.addf %87, %88 : vector<2x128xf32>
    %90 = math.tanh %89 : vector<2x128xf32>
    %91 = vector.extract_strided_slice %90 {offsets = [0, 0], sizes = [2, 32], strides = [1, 1]} : vector<2x128xf32> to vector<2x32xf32>
    %cst_27 = arith.constant 5.000000e-01 : f32
    %92 = vector.broadcast %cst_27 : f32 to vector<2x32xf32>
    %93 = arith.mulf %92, %91 : vector<2x32xf32>
    %cst_28 = arith.constant 5.000000e-01 : f32
    %94 = vector.broadcast %cst_28 : f32 to vector<2x32xf32>
    %95 = arith.addf %93, %94 : vector<2x32xf32>
    %96 = vector.extract_strided_slice %90 {offsets = [0, 32], sizes = [2, 32], strides = [1, 1]} : vector<2x128xf32> to vector<2x32xf32>
    %cst_29 = arith.constant 5.000000e-01 : f32
    %97 = vector.broadcast %cst_29 : f32 to vector<2x32xf32>
    %98 = arith.mulf %97, %96 : vector<2x32xf32>
    %cst_30 = arith.constant 5.000000e-01 : f32
    %99 = vector.broadcast %cst_30 : f32 to vector<2x32xf32>
    %100 = arith.addf %98, %99 : vector<2x32xf32>
    %101 = vector.extract_strided_slice %90 {offsets = [0, 64], sizes = [2, 32], strides = [1, 1]} : vector<2x128xf32> to vector<2x32xf32>
    %102 = vector.extract_strided_slice %90 {offsets = [0, 96], sizes = [2, 32], strides = [1, 1]} : vector<2x128xf32> to vector<2x32xf32>
    %cst_31 = arith.constant 5.000000e-01 : f32
    %103 = vector.broadcast %cst_31 : f32 to vector<2x32xf32>
    %104 = arith.mulf %103, %102 : vector<2x32xf32>
    %cst_32 = arith.constant 5.000000e-01 : f32
    %105 = vector.broadcast %cst_32 : f32 to vector<2x32xf32>
    %106 = arith.addf %104, %105 : vector<2x32xf32>
    %107 = arith.mulf %100, %84 : vector<2x32xf32>
    %108 = arith.mulf %95, %101 : vector<2x32xf32>
    %109 = arith.addf %107, %108 : vector<2x32xf32>
    %110 = math.tanh %109 : vector<2x32xf32>
    %111 = arith.mulf %106, %110 : vector<2x32xf32>
    %112 = vector.extract_strided_slice %9 {offsets = [8, 0], sizes = [2, 128], strides = [1, 1]} : vector<16x128xf32> to vector<2x128xf32>
    %cst_33 = arith.constant dense<0.000000e+00> : vector<2x128xf32>
    %113 = tpu.matmul %111, %3, %cst_33 {dimension_numbers = #tpu.dot_dimension_numbers<[1], [0], [0], [1], [0, 0, 1, 1], [], []>} : vector<2x32xf32>, vector<32x128xf32>, vector<2x128xf32> -> vector<2x128xf32>
    %114 = arith.addf %112, %113 : vector<2x128xf32>
    %115 = math.tanh %114 : vector<2x128xf32>
    %116 = vector.extract_strided_slice %115 {offsets = [0, 0], sizes = [2, 32], strides = [1, 1]} : vector<2x128xf32> to vector<2x32xf32>
    %cst_34 = arith.constant 5.000000e-01 : f32
    %117 = vector.broadcast %cst_34 : f32 to vector<2x32xf32>
    %118 = arith.mulf %117, %116 : vector<2x32xf32>
    %cst_35 = arith.constant 5.000000e-01 : f32
    %119 = vector.broadcast %cst_35 : f32 to vector<2x32xf32>
    %120 = arith.addf %118, %119 : vector<2x32xf32>
    %121 = vector.extract_strided_slice %115 {offsets = [0, 32], sizes = [2, 32], strides = [1, 1]} : vector<2x128xf32> to vector<2x32xf32>
    %cst_36 = arith.constant 5.000000e-01 : f32
    %122 = vector.broadcast %cst_36 : f32 to vector<2x32xf32>
    %123 = arith.mulf %122, %121 : vector<2x32xf32>
    %cst_37 = arith.constant 5.000000e-01 : f32
    %124 = vector.broadcast %cst_37 : f32 to vector<2x32xf32>
    %125 = arith.addf %123, %124 : vector<2x32xf32>
    %126 = vector.extract_strided_slice %115 {offsets = [0, 64], sizes = [2, 32], strides = [1, 1]} : vector<2x128xf32> to vector<2x32xf32>
    %127 = vector.extract_strided_slice %115 {offsets = [0, 96], sizes = [2, 32], strides = [1, 1]} : vector<2x128xf32> to vector<2x32xf32>
    %cst_38 = arith.constant 5.000000e-01 : f32
    %128 = vector.broadcast %cst_38 : f32 to vector<2x32xf32>
    %129 = arith.mulf %128, %127 : vector<2x32xf32>
    %cst_39 = arith.constant 5.000000e-01 : f32
    %130 = vector.broadcast %cst_39 : f32 to vector<2x32xf32>
    %131 = arith.addf %129, %130 : vector<2x32xf32>
    %132 = arith.mulf %125, %109 : vector<2x32xf32>
    %133 = arith.mulf %120, %126 : vector<2x32xf32>
    %134 = arith.addf %132, %133 : vector<2x32xf32>
    %135 = math.tanh %134 : vector<2x32xf32>
    %136 = arith.mulf %131, %135 : vector<2x32xf32>
    %137 = vector.extract_strided_slice %9 {offsets = [10, 0], sizes = [2, 128], strides = [1, 1]} : vector<16x128xf32> to vector<2x128xf32>
    %cst_40 = arith.constant dense<0.000000e+00> : vector<2x128xf32>
    %138 = tpu.matmul %136, %3, %cst_40 {dimension_numbers = #tpu.dot_dimension_numbers<[1], [0], [0], [1], [0, 0, 1, 1], [], []>} : vector<2x32xf32>, vector<32x128xf32>, vector<2x128xf32> -> vector<2x128xf32>
    %139 = arith.addf %137, %138 : vector<2x128xf32>
    %140 = math.tanh %139 : vector<2x128xf32>
    %141 = vector.extract_strided_slice %140 {offsets = [0, 0], sizes = [2, 32], strides = [1, 1]} : vector<2x128xf32> to vector<2x32xf32>
    %cst_41 = arith.constant 5.000000e-01 : f32
    %142 = vector.broadcast %cst_41 : f32 to vector<2x32xf32>
    %143 = arith.mulf %142, %141 : vector<2x32xf32>
    %cst_42 = arith.constant 5.000000e-01 : f32
    %144 = vector.broadcast %cst_42 : f32 to vector<2x32xf32>
    %145 = arith.addf %143, %144 : vector<2x32xf32>
    %146 = vector.extract_strided_slice %140 {offsets = [0, 32], sizes = [2, 32], strides = [1, 1]} : vector<2x128xf32> to vector<2x32xf32>
    %cst_43 = arith.constant 5.000000e-01 : f32
    %147 = vector.broadcast %cst_43 : f32 to vector<2x32xf32>
    %148 = arith.mulf %147, %146 : vector<2x32xf32>
    %cst_44 = arith.constant 5.000000e-01 : f32
    %149 = vector.broadcast %cst_44 : f32 to vector<2x32xf32>
    %150 = arith.addf %148, %149 : vector<2x32xf32>
    %151 = vector.extract_strided_slice %140 {offsets = [0, 64], sizes = [2, 32], strides = [1, 1]} : vector<2x128xf32> to vector<2x32xf32>
    %152 = vector.extract_strided_slice %140 {offsets = [0, 96], sizes = [2, 32], strides = [1, 1]} : vector<2x128xf32> to vector<2x32xf32>
    %cst_45 = arith.constant 5.000000e-01 : f32
    %153 = vector.broadcast %cst_45 : f32 to vector<2x32xf32>
    %154 = arith.mulf %153, %152 : vector<2x32xf32>
    %cst_46 = arith.constant 5.000000e-01 : f32
    %155 = vector.broadcast %cst_46 : f32 to vector<2x32xf32>
    %156 = arith.addf %154, %155 : vector<2x32xf32>
    %157 = arith.mulf %150, %134 : vector<2x32xf32>
    %158 = arith.mulf %145, %151 : vector<2x32xf32>
    %159 = arith.addf %157, %158 : vector<2x32xf32>
    %160 = math.tanh %159 : vector<2x32xf32>
    %161 = arith.mulf %156, %160 : vector<2x32xf32>
    %162 = vector.extract_strided_slice %9 {offsets = [12, 0], sizes = [2, 128], strides = [1, 1]} : vector<16x128xf32> to vector<2x128xf32>
    %cst_47 = arith.constant dense<0.000000e+00> : vector<2x128xf32>
    %163 = tpu.matmul %161, %3, %cst_47 {dimension_numbers = #tpu.dot_dimension_numbers<[1], [0], [0], [1], [0, 0, 1, 1], [], []>} : vector<2x32xf32>, vector<32x128xf32>, vector<2x128xf32> -> vector<2x128xf32>
    %164 = arith.addf %162, %163 : vector<2x128xf32>
    %165 = math.tanh %164 : vector<2x128xf32>
    %166 = vector.extract_strided_slice %165 {offsets = [0, 0], sizes = [2, 32], strides = [1, 1]} : vector<2x128xf32> to vector<2x32xf32>
    %cst_48 = arith.constant 5.000000e-01 : f32
    %167 = vector.broadcast %cst_48 : f32 to vector<2x32xf32>
    %168 = arith.mulf %167, %166 : vector<2x32xf32>
    %cst_49 = arith.constant 5.000000e-01 : f32
    %169 = vector.broadcast %cst_49 : f32 to vector<2x32xf32>
    %170 = arith.addf %168, %169 : vector<2x32xf32>
    %171 = vector.extract_strided_slice %165 {offsets = [0, 32], sizes = [2, 32], strides = [1, 1]} : vector<2x128xf32> to vector<2x32xf32>
    %cst_50 = arith.constant 5.000000e-01 : f32
    %172 = vector.broadcast %cst_50 : f32 to vector<2x32xf32>
    %173 = arith.mulf %172, %171 : vector<2x32xf32>
    %cst_51 = arith.constant 5.000000e-01 : f32
    %174 = vector.broadcast %cst_51 : f32 to vector<2x32xf32>
    %175 = arith.addf %173, %174 : vector<2x32xf32>
    %176 = vector.extract_strided_slice %165 {offsets = [0, 64], sizes = [2, 32], strides = [1, 1]} : vector<2x128xf32> to vector<2x32xf32>
    %177 = vector.extract_strided_slice %165 {offsets = [0, 96], sizes = [2, 32], strides = [1, 1]} : vector<2x128xf32> to vector<2x32xf32>
    %cst_52 = arith.constant 5.000000e-01 : f32
    %178 = vector.broadcast %cst_52 : f32 to vector<2x32xf32>
    %179 = arith.mulf %178, %177 : vector<2x32xf32>
    %cst_53 = arith.constant 5.000000e-01 : f32
    %180 = vector.broadcast %cst_53 : f32 to vector<2x32xf32>
    %181 = arith.addf %179, %180 : vector<2x32xf32>
    %182 = arith.mulf %175, %159 : vector<2x32xf32>
    %183 = arith.mulf %170, %176 : vector<2x32xf32>
    %184 = arith.addf %182, %183 : vector<2x32xf32>
    %185 = math.tanh %184 : vector<2x32xf32>
    %186 = arith.mulf %181, %185 : vector<2x32xf32>
    %187 = vector.extract_strided_slice %9 {offsets = [14, 0], sizes = [2, 128], strides = [1, 1]} : vector<16x128xf32> to vector<2x128xf32>
    %cst_54 = arith.constant dense<0.000000e+00> : vector<2x128xf32>
    %188 = tpu.matmul %186, %3, %cst_54 {dimension_numbers = #tpu.dot_dimension_numbers<[1], [0], [0], [1], [0, 0, 1, 1], [], []>} : vector<2x32xf32>, vector<32x128xf32>, vector<2x128xf32> -> vector<2x128xf32>
    %189 = arith.addf %187, %188 : vector<2x128xf32>
    %190 = math.tanh %189 : vector<2x128xf32>
    %191 = vector.extract_strided_slice %190 {offsets = [0, 0], sizes = [2, 32], strides = [1, 1]} : vector<2x128xf32> to vector<2x32xf32>
    %cst_55 = arith.constant 5.000000e-01 : f32
    %192 = vector.broadcast %cst_55 : f32 to vector<2x32xf32>
    %193 = arith.mulf %192, %191 : vector<2x32xf32>
    %cst_56 = arith.constant 5.000000e-01 : f32
    %194 = vector.broadcast %cst_56 : f32 to vector<2x32xf32>
    %195 = arith.addf %193, %194 : vector<2x32xf32>
    %196 = vector.extract_strided_slice %190 {offsets = [0, 32], sizes = [2, 32], strides = [1, 1]} : vector<2x128xf32> to vector<2x32xf32>
    %cst_57 = arith.constant 5.000000e-01 : f32
    %197 = vector.broadcast %cst_57 : f32 to vector<2x32xf32>
    %198 = arith.mulf %197, %196 : vector<2x32xf32>
    %cst_58 = arith.constant 5.000000e-01 : f32
    %199 = vector.broadcast %cst_58 : f32 to vector<2x32xf32>
    %200 = arith.addf %198, %199 : vector<2x32xf32>
    %201 = vector.extract_strided_slice %190 {offsets = [0, 64], sizes = [2, 32], strides = [1, 1]} : vector<2x128xf32> to vector<2x32xf32>
    %202 = vector.extract_strided_slice %190 {offsets = [0, 96], sizes = [2, 32], strides = [1, 1]} : vector<2x128xf32> to vector<2x32xf32>
    %cst_59 = arith.constant 5.000000e-01 : f32
    %203 = vector.broadcast %cst_59 : f32 to vector<2x32xf32>
    %204 = arith.mulf %203, %202 : vector<2x32xf32>
    %cst_60 = arith.constant 5.000000e-01 : f32
    %205 = vector.broadcast %cst_60 : f32 to vector<2x32xf32>
    %206 = arith.addf %204, %205 : vector<2x32xf32>
    %207 = arith.mulf %200, %184 : vector<2x32xf32>
    %208 = arith.mulf %195, %201 : vector<2x32xf32>
    %209 = arith.addf %207, %208 : vector<2x32xf32>
    %210 = math.tanh %209 : vector<2x32xf32>
    %211 = arith.mulf %206, %210 : vector<2x32xf32>
    %212 = vector.broadcast %4 : vector<1x32xf32> to vector<2x32xf32>
    %213 = arith.mulf %211, %212 : vector<2x32xf32>
    %cst_61 = arith.constant dense<0.000000e+00> : vector<2xf32>
    %214 = vector.multi_reduction <add>, %213, %cst_61 [1] : vector<2x32xf32> to vector<2xf32>
    %215 = vector.shape_cast %214 : vector<2xf32> to vector<2x1xf32>
    %216 = vector.broadcast %5 : vector<1x1xf32> to vector<2x1xf32>
    %217 = arith.addf %215, %216 : vector<2x1xf32>
    %c0_62 = arith.constant 0 : index
    %c0_63 = arith.constant 0 : index
    %218 = vector.load %arg2[%c0_62, %c0_63] : memref<2x1xf32, #tpu.memory_space<vmem>>, vector<2x1xf32>
    tpu.vector_store %arg2[%c0_62, %c0_63], %217 {strides = array<i32>} : memref<2x1xf32, #tpu.memory_space<vmem>>, vector<2x1xf32>,
    return
  }
}

</mosaic_0001>

<bundles_post_ra>
// kernel: tpu_custom_call.1
= control target key start
LH: loop header
LB: loop body
LE: loop exit
PB: predicated region body
PF: predicated region fallthrough
CT: control target
= control target key end

     0   :  { %7 = vsyncpa [#allocation3], 0  ;;  %s581_s12 = smov [#allocation2]   ;;  %s582_s14 = smov 128   ;;  %s675_s0 = inlined_call_operand.vmem [shape: f32[16,2], index: 0, kind: input, shape index: {}]   ;;  %s676_s1 = inlined_call_operand.hbm [shape: f32[64,128], index: 1, kind: input, shape index: {}]   ;;  %s677_s2 = inlined_call_operand.vmem [shape: f32[2,1], index: 2, kind: output, shape index: {}]  }
   0x1   :  { %s14_s11 = sshll.u32 %s676_s1, 4  ;;  %s16_s13 = sshll.u32 %s581_s12, 4  ;;  %s15_s11 = int_to_ptr.hbm [resolvable:$true] %s14_s11  ;;  %s17_s13 = int_to_ptr.vmem [resolvable:$true] %s16_s13 }
   0x2   :  { %s583_s15 = smov 8  }
   0x3   :  { %22 = dma.hbm_to_vmem [thread:$0]  %s15_s11, 1024, %s17_s13, [#allocation3], %s582_s14, %s582_s14, %s583_s15  }
   0x4   :  { %579 = dma.done.wait [#allocation3], 1024  }
   0x5   :  { %580 = vsyncadd [#allocation3], 4294966272  ;;  %vm45_vm0 = vcmask 1041408   ;;  %vm38_vm1 = vcmask 15360   ;;  %v32_v0 = vld [vmem:[#allocation2 + $0x28] sm:$0xff]  ;;  %v31_v1 = vld [vmem:[#allocation2 + $0x20] sm:$0xff] }
   0x6   :  { %v27_v2 = vld [vmem:[#allocation2] sm:$0xff]  ;;  %88 = vmatpush.msra.mxu1 %v32_v0  ;;  %v30_v4 = vld [vmem:[#allocation2 + $0x18] sm:$0xff]  ;;  %134 = vmatpush.msra.mxu2 %v32_v0  ;;  %v29_v5 = vld [vmem:[#allocation2 + $0x10] sm:$0xff]  ;;  %v584_v6 = vmov 0.0   ;;  %s585_s1 = smov 64   ;;  %s586_s18 = smov 32  }
   0x7   :  { %506 = vmatpush.msk.msra.mxu0 %vm45_vm0, %v27_v2  ;;  %v35_v3 = vld [vmem:[%s675_s0] sm:$0xff]  ;;  %187 = vmatpush.msra.mxu3 %v32_v0  ;;  %v610_v7 = vld [vmem:[#allocation2 + $0x8] sm:$0xff]  ;;  %vm72_vm2 = vcmask 261120   ;;  %vm493_vm3 = vcmask 261126   ;;  %vm499_vm4 = vcmask 7174  }
   0x8   :  { %507 = vmatmul.msk.f32.vlgmr.msra.gmra.mxu0 %vm38_vm1, %v35_v3  ;;  %89 = vmatpush.msra.mxu1 %v31_v1  ;;  %v37_v8 = vperm.slane %v610_v7, 0 }
   0x9   :  { %135 = vmatpush.msra.mxu2 %v31_v1  ;;  %395 = vmatpush.msrb.mxu0 %v32_v0 }
   0xa   :  { %90 = vmatpush.msra.mxu1 %v30_v4  ;;  %188 = vmatpush.msra.mxu3 %v31_v1 }
   0xb   :  { %136 = vmatpush.msra.mxu2 %v30_v4  ;;  %396 = vmatpush.msrb.mxu0 %v31_v1 }
   0xc   :  { %91 = vmatpush.msra.mxu1 %v29_v5  ;;  %189 = vmatpush.msra.mxu3 %v30_v4 }
   0xd   :  { %92 = vmatmul.f32.vlgmr.msra.gmra.mxu1 %v584_v6  ;;  %137 = vmatpush.msra.mxu2 %v29_v5 }
   0xe   :  { %190 = vmatpush.msra.mxu3 %v29_v5  ;;  %240 = vmatpush.msrb.mxu1 %v32_v0 }
   0xf   :  { %293 = vmatpush.msrb.mxu2 %v32_v0  ;;  %397 = vmatpush.msrb.mxu0 %v30_v4 }
  0x10   :  { %342 = vmatpush.msrb.mxu3 %v32_v0  ;;  %241 = vmatpush.msrb.mxu1 %v31_v1 }
  0x11   :  { %294 = vmatpush.msrb.mxu2 %v31_v1  ;;  %398 = vmatpush.msrb.mxu0 %v29_v5 }
  0x12   :  { %343 = vmatpush.msrb.mxu3 %v31_v1  ;;  %242 = vmatpush.msrb.mxu1 %v30_v4 }
  0x13   :  { %295 = vmatpush.msrb.mxu2 %v30_v4 }
  0x14   :  { %344 = vmatpush.msrb.mxu3 %v30_v4  ;;  %243 = vmatpush.msrb.mxu1 %v29_v5 }
  0x15   :  { %296 = vmatpush.msrb.mxu2 %v29_v5 }
  0x16   :  { %345 = vmatpush.msrb.mxu3 %v29_v5  ;;  %448 = vmatpush.msra.mxu1 %v32_v0 }
  0x18   :  { %449 = vmatpush.msra.mxu1 %v31_v1 }
  0x1a   :  { %450 = vmatpush.msra.mxu1 %v30_v4 }
  0x1c   :  { %451 = vmatpush.msra.mxu1 %v29_v5 }
  0x85   :  { %v66_v9 = vpop.f32.mrf.mxu0 }
  0x86   :  { %v615_v10 = vadd.f32 %v66_v9, %v37_v8 }
  0x8a   :  { %v93_v11 = vpop.f32.mrf.mxu1 }
  0x8b   :  { %v96_v12 = vadd.f32 %v93_v11, %v615_v10 }
  0x8d   :  { %523 = vtanh.f32 %v96_v12 }
  0x93   :  { %v524_v13 = vpop.eup %523 }
  0x94   :  { %102 = vrot.lane.b32.xlu0 %v524_v13, %s585_s1  ;;  %v98_v14 = vmul.f32 0.5, %v524_v13  ;;  %v36_v13 = vld [vmem:[%s675_s0 + $0x8] sm:$0xff]  ;;  %s587_s0 = smov 96  }
  0x95   :  { %508 = vmatmul.msk.f32.gmra.mxu0 %vm38_vm1, %v36_v13 }
  0x96   :  { %v99_v15 = vadd.f32 0.5, %v98_v14 }
  0x98   :  { %v100_v18 = vmul.f32 0.0, %v99_v15 }
 0x106   :  { %v103_v16 = vpop.permute.xlu0 %102 }
 0x107   :  { %v105_v17 = vmul.f32 %v103_v16, %v99_v15 }
 0x109   :  { %107 = vrot.lane.b32.xlu0 %v105_v17, %s586_s18 }
 0x17b   :  { %v108_v19 = vpop.permute.xlu0 %107 }
 0x17c   :  { %v110_v20 = vadd.f32 %v108_v19, %v100_v18 }
 0x17e   :  { %525 = vtanh.f32 %v110_v20  ;;  %v150_v33 = vrot.slane %v110_v20, 6 }
 0x184   :  { %v526_v21 = vpop.eup %525 }
 0x185   :  { %113 = vrot.lane.b32.xlu1 %v526_v21, %s585_s1 }
 0x1f7   :  { %v114_v22 = vpop.permute.xlu1 %113 }
 0x1f8   :  { %v116_v23 = vmul.f32 %v114_v22, %v99_v15  ;;  %v69_v15 = vpop.f32.mrf.mxu0 }
 0x1f9   :  { %v647_v16 = vadd.f32 %v69_v15, %v37_v8 }
 0x1fa   :  { %118 = vrot.lane.b32.xlu1 %v116_v23, %s586_s18 }
 0x26c   :  { %v119_v24 = vpop.permute.xlu1 %118 }
 0x26d   :  { %509 = vmatmul.msk.f32.vlgmr.msra.gmra.mxu2 %vm72_vm2, %v119_v24 }
 0x2f0   :  { %v139_v25 = vpop.f32.mrf.mxu2 }
 0x2f1   :  { %v143_v26 = vrot.slane %v139_v25, 6 }
 0x2f3   :  { %v145_v27 = vadd.f32 %v143_v26, %v615_v10 }
 0x2f5   :  { %527 = vtanh.f32 %v145_v27 }
 0x2fb   :  { %v528_v28 = vpop.eup %527 }
 0x2fc   :  { %154 = vrot.lane.b32.xlu2 %v528_v28, %s585_s1  ;;  %v147_v29 = vmul.f32 0.5, %v528_v28 }
 0x2fe   :  { %v148_v30 = vadd.f32 0.5, %v147_v29 }
 0x300   :  { %v152_v34 = vmul.f32 %v150_v33, %v148_v30 }
 0x356   :  { %v155_v31 = vpop.permute.xlu2 %154 }
 0x357   :  { %v157_v32 = vmul.f32 %v155_v31, %v148_v30 }
 0x359   :  { %159 = vrot.lane.b32.xlu2 %v157_v32, %s586_s18 }
 0x3b3   :  { %v160_v35 = vpop.permute.xlu2 %159 }
 0x3b4   :  { %v162_v36 = vadd.f32 %v160_v35, %v152_v34 }
 0x3b6   :  { %529 = vtanh.f32 %v162_v36  ;;  %v203_v50 = vrot.slane %v162_v36, 6 }
 0x3bc   :  { %v530_v37 = vpop.eup %529 }
 0x3bd   :  { %165 = vrot.lane.b32.xlu0 %v530_v37, %s585_s1 }
 0x42f   :  { %v166_v38 = vpop.permute.xlu0 %165 }
 0x430   :  { %v168_v39 = vmul.f32 %v166_v38, %v148_v30 }
 0x432   :  { %v170_v40 = vrot.slane %v168_v39, 2 }
 0x434   :  { %171 = vrot.lane.b32.xlu1 %v170_v40, %s586_s18 }
 0x4a6   :  { %v172_v41 = vpop.permute.xlu1 %171 }
 0x4a7   :  { %510 = vmatmul.msk.f32.vlgmr.msra.gmra.mxu3 %vm72_vm2, %v172_v41 }
 0x52a   :  { %v192_v42 = vpop.f32.mrf.mxu3 }
 0x52b   :  { %v196_v43 = vrot.slane %v192_v42, 4 }
 0x52d   :  { %v198_v44 = vadd.f32 %v196_v43, %v615_v10 }
 0x52f   :  { %531 = vtanh.f32 %v198_v44 }
 0x535   :  { %v532_v45 = vpop.eup %531 }
 0x536   :  { %207 = vrot.lane.b32.xlu2 %v532_v45, %s585_s1  ;;  %v200_v46 = vmul.f32 0.5, %v532_v45 }
 0x538   :  { %v201_v47 = vadd.f32 0.5, %v200_v46 }
 0x53a   :  { %v205_v51 = vmul.f32 %v203_v50, %v201_v47 }
 0x590   :  { %v208_v48 = vpop.permute.xlu2 %207 }
 0x591   :  { %v210_v49 = vmul.f32 %v208_v48, %v201_v47 }
 0x593   :  { %212 = vrot.lane.b32.xlu0 %v210_v49, %s586_s18 }
 0x605   :  { %v213_v52 = vpop.permute.xlu0 %212 }
 0x606   :  { %v215_v53 = vadd.f32 %v213_v52, %v205_v51 }
 0x608   :  { %533 = vtanh.f32 %v215_v53  ;;  %v256_v3 = vrot.slane %v215_v53, 6 }
 0x60e   :  { %v534_v54 = vpop.eup %533 }
 0x60f   :  { %218 = vrot.lane.b32.xlu1 %v534_v54, %s585_s1 }
 0x681   :  { %v219_v55 = vpop.permute.xlu1 %218 }
 0x682   :  { %v221_v56 = vmul.f32 %v219_v55, %v201_v47 }
 0x684   :  { %v223_v57 = vrot.slane %v221_v56, 4 }
 0x686   :  { %224 = vrot.lane.b32.xlu2 %v223_v57, %s586_s18 }
 0x6e0   :  { %v225_v58 = vpop.permute.xlu2 %224 }
 0x6e1   :  { %511 = vmatmul.msk.f32.vlgmr.msrb.gmra.mxu1 %vm72_vm2, %v225_v58 }
 0x75e   :  { %v245_v59 = vpop.f32.mrf.mxu1 }
 0x75f   :  { %v249_v60 = vrot.slane %v245_v59, 2 }
 0x761   :  { %v251_v61 = vadd.f32 %v249_v60, %v615_v10 }
 0x763   :  { %535 = vtanh.f32 %v251_v61 }
 0x769   :  { %v536_v62 = vpop.eup %535 }
 0x76a   :  { %260 = vrot.lane.b32.xlu0 %v536_v62, %s585_s1  ;;  %v253_v63 = vmul.f32 0.5, %v536_v62 }
 0x76c   :  { %v254_v0 = vadd.f32 0.5, %v253_v63 }
 0x76e   :  { %v258_v4 = vmul.f32 %v256_v3, %v254_v0 }
 0x7dc   :  { %v261_v1 = vpop.permute.xlu0 %260 }
 0x7dd   :  { %v263_v2 = vmul.f32 %v261_v1, %v254_v0 }
 0x7df   :  { %265 = vrot.lane.b32.xlu1 %v263_v2, %s586_s18 }
 0x851   :  { %v266_v5 = vpop.permute.xlu1 %265 }
 0x852   :  { %v268_v6 = vadd.f32 %v266_v5, %v258_v4 }
 0x854   :  { %537 = vtanh.f32 %v268_v6  ;;  %v306_v24 = vrot.slane %v268_v6, 6 }
 0x85a   :  { %v538_v9 = vpop.eup %537 }
 0x85b   :  { %271 = vrot.lane.b32.xlu2 %v538_v9, %s585_s1 }
 0x8b5   :  { %v272_v11 = vpop.permute.xlu2 %271 }
 0x8b6   :  { %v274_v10 = vmul.f32 %v272_v11, %v254_v0  ;;  %v33_v11 = vld [vmem:[#allocation2 + $0x30] sm:$0xff] }
 0x8b8   :  { %v276_v12 = vrot.slane %v274_v10, 6  ;;  %v483_v10 = vperm.slane %v33_v11, 0 }
 0x8ba   :  { %277 = vrot.lane.b32.xlu0 %v276_v12, %s586_s18 }
 0x92c   :  { %v278_v14 = vpop.permute.xlu0 %277 }
 0x92d   :  { %512 = vmatmul.msk.f32.vlgmr.msrb.gmra.mxu2 %vm72_vm2, %v278_v14 }
 0x9b0   :  { %v298_v17 = vpop.f32.mrf.mxu2 }
 0x9b1   :  { %v301_v18 = vadd.f32 %v298_v17, %v647_v16 }
 0x9b3   :  { %539 = vtanh.f32 %v301_v18 }
 0x9b9   :  { %v540_v19 = vpop.eup %539 }
 0x9ba   :  { %310 = vrot.lane.b32.xlu1 %v540_v19, %s585_s1  ;;  %v303_v20 = vmul.f32 0.5, %v540_v19 }
 0x9bc   :  { %v304_v21 = vadd.f32 0.5, %v303_v20 }
 0x9be   :  { %v308_v25 = vmul.f32 %v306_v24, %v304_v21 }
 0xa2c   :  { %v311_v22 = vpop.permute.xlu1 %310 }
 0xa2d   :  { %v313_v23 = vmul.f32 %v311_v22, %v304_v21 }
 0xa2f   :  { %315 = vrot.lane.b32.xlu2 %v313_v23, %s586_s18  ;;  %v34_v23 = vld [vmem:[#allocation2 + $0x38] sm:$0xff] }
 0xa30   :  { %v497_v24 = vperm.slane %v34_v23, 0 }
 0xa89   :  { %v316_v26 = vpop.permute.xlu2 %315 }
 0xa8a   :  { %v318_v27 = vadd.f32 %v316_v26, %v308_v25 }
 0xa8c   :  { %541 = vtanh.f32 %v318_v27  ;;  %v358_v38 = vrot.slane %v318_v27, 6 }
 0xa92   :  { %v542_v7 = vpop.eup %541 }
 0xa93   :  { %321 = vrot.lane.b32.xlu0 %v542_v7, %s585_s1 }
 0xb05   :  { %v322_v8 = vpop.permute.xlu0 %321 }
 0xb06   :  { %v324_v28 = vmul.f32 %v322_v8, %v304_v21 }
 0xb08   :  { %326 = vrot.lane.b32.xlu1 %v324_v28, %s586_s18 }
 0xb7a   :  { %v327_v29 = vpop.permute.xlu1 %326 }
 0xb7b   :  { %513 = vmatmul.msk.f32.vlgmr.msrb.gmra.mxu3 %vm72_vm2, %v327_v29 }
 0xbfe   :  { %v347_v30 = vpop.f32.mrf.mxu3 }
 0xbff   :  { %v351_v31 = vrot.slane %v347_v30, 6 }
 0xc01   :  { %v353_v32 = vadd.f32 %v351_v31, %v647_v16 }
 0xc03   :  { %543 = vtanh.f32 %v353_v32 }
 0xc09   :  { %v544_v33 = vpop.eup %543 }
 0xc0a   :  { %362 = vrot.lane.b32.xlu2 %v544_v33, %s585_s1  ;;  %v355_v34 = vmul.f32 0.5, %v544_v33 }
 0xc0c   :  { %v356_v35 = vadd.f32 0.5, %v355_v34 }
 0xc0e   :  { %v360_v39 = vmul.f32 %v358_v38, %v356_v35 }
 0xc64   :  { %v363_v36 = vpop.permute.xlu2 %362 }
 0xc65   :  { %v365_v37 = vmul.f32 %v363_v36, %v356_v35 }
 0xc67   :  { %367 = vrot.lane.b32.xlu0 %v365_v37, %s586_s18 }
 0xcd9   :  { %v368_v40 = vpop.permute.xlu0 %367 }
 0xcda   :  { %v370_v41 = vadd.f32 %v368_v40, %v360_v39 }
 0xcdc   :  { %545 = vtanh.f32 %v370_v41  ;;  %v411_v55 = vrot.slane %v370_v41, 6 }
 0xce2   :  { %v546_v42 = vpop.eup %545 }
 0xce3   :  { %373 = vrot.lane.b32.xlu1 %v546_v42, %s585_s1 }
 0xd55   :  { %v374_v43 = vpop.permute.xlu1 %373 }
 0xd56   :  { %v376_v44 = vmul.f32 %v374_v43, %v356_v35 }
 0xd58   :  { %v378_v45 = vrot.slane %v376_v44, 2 }
 0xd5a   :  { %379 = vrot.lane.b32.xlu2 %v378_v45, %s586_s18 }
 0xdb4   :  { %v380_v46 = vpop.permute.xlu2 %379 }
 0xdb5   :  { %514 = vmatmul.msk.f32.vlgmr.msrb.gmra.mxu0 %vm72_vm2, %v380_v46 }
 0xe32   :  { %v400_v47 = vpop.f32.mrf.mxu0 }
 0xe33   :  { %v404_v48 = vrot.slane %v400_v47, 4 }
 0xe35   :  { %v406_v49 = vadd.f32 %v404_v48, %v647_v16 }
 0xe37   :  { %547 = vtanh.f32 %v406_v49 }
 0xe3d   :  { %v548_v50 = vpop.eup %547 }
 0xe3e   :  { %415 = vrot.lane.b32.xlu0 %v548_v50, %s585_s1  ;;  %v408_v51 = vmul.f32 0.5, %v548_v50 }
 0xe40   :  { %v409_v52 = vadd.f32 0.5, %v408_v51 }
 0xe42   :  { %v413_v56 = vmul.f32 %v411_v55, %v409_v52 }
 0xeb0   :  { %v416_v53 = vpop.permute.xlu0 %415 }
 0xeb1   :  { %v418_v54 = vmul.f32 %v416_v53, %v409_v52 }
 0xeb3   :  { %420 = vrot.lane.b32.xlu1 %v418_v54, %s586_s18 }
 0xf25   :  { %v421_v57 = vpop.permute.xlu1 %420 }
 0xf26   :  { %v423_v58 = vadd.f32 %v421_v57, %v413_v56 }
 0xf28   :  { %549 = vtanh.f32 %v423_v58  ;;  %v464_v12 = vrot.slane %v423_v58, 6 }
 0xf2e   :  { %v550_v59 = vpop.eup %549 }
 0xf2f   :  { %426 = vrot.lane.b32.xlu2 %v550_v59, %s585_s1 }
 0xf89   :  { %v427_v60 = vpop.permute.xlu2 %426 }
 0xf8a   :  { %v429_v61 = vmul.f32 %v427_v60, %v409_v52 }
 0xf8c   :  { %v431_v62 = vrot.slane %v429_v61, 4 }
 0xf8e   :  { %432 = vrot.lane.b32.xlu0 %v431_v62, %s586_s18 }
0x1000   :  { %v433_v63 = vpop.permute.xlu0 %432 }
0x1001   :  { %515 = vmatmul.msk.f32.vlgmr.msra.gmra.mxu1 %vm72_vm2, %v433_v63 }
0x107e   :  { %v453_v0 = vpop.f32.mrf.mxu1 }
0x107f   :  { %v457_v1 = vrot.slane %v453_v0, 2 }
0x1081   :  { %v459_v2 = vadd.f32 %v457_v1, %v647_v16 }
0x1083   :  { %551 = vtanh.f32 %v459_v2 }
0x1089   :  { %v552_v3 = vpop.eup %551 }
0x108a   :  { %468 = vrot.lane.b32.xlu1 %v552_v3, %s585_s1  ;;  %v461_v4 = vmul.f32 0.5, %v552_v3 }
0x108c   :  { %v462_v5 = vadd.f32 0.5, %v461_v4 }
0x108e   :  { %v466_v13 = vmul.f32 %v464_v12, %v462_v5 }
0x1092   :  { %485 = vrot.lane.b32.xlu1 %v483_v10, %s587_s0 }
0x10fc   :  { %v469_v6 = vpop.permute.xlu1 %468 }
0x10fd   :  { %v471_v9 = vmul.f32 %v469_v6, %v462_v5 }
0x10ff   :  { %473 = vrot.lane.b32.xlu2 %v471_v9, %s586_s18 }
0x1104   :  { %v486_v18 = vpop.permute.xlu1 %485 }
0x1159   :  { %v474_v14 = vpop.permute.xlu2 %473 }
0x115a   :  { %v476_v15 = vadd.f32 %v474_v14, %v466_v13 }
0x115c   :  { %553 = vtanh.f32 %v476_v15 }
0x1162   :  { %v554_v16 = vpop.eup %553 }
0x1163   :  { %479 = vrot.lane.b32.xlu0 %v554_v16, %s585_s1 }
0x11d5   :  { %v480_v17 = vpop.permute.xlu0 %479 }
0x11d6   :  { %v482_v19 = vmul.f32 %v480_v17, %v462_v5 }
0x11d8   :  { %v488_v20 = vmul.f32 %v486_v18, %v482_v19 }
0x11da   :  { %490 = vrot.lane.b32.xlu2 %v488_v20, %s586_s18 }
0x1234   :  { %v491_v21 = vpop.permute.xlu2 %490 }
0x1235   :  { %v494_v22 = vsel %vm493_vm3, %v491_v21, 0.0 }
0x1236   :  { %495 = vadd.xlane.f32.xlu0 %v494_v22 }
0x12a9   :  { %v496_v25 = vpop.xlane.xlu0 %495 }
0x12aa   :  { %v498_v26 = vadd.f32 %v497_v24, %v496_v25 }
0x12ac   :  { %500 = vst.msk [vmem:[%s677_s2 - $0x6] sm:$0xc0] %vm499_vm4, %v498_v26 }
0x12ad   :  { %505 = vsyncpa [#allocation3], 1 }

</bundles_post_ra>
